<compile_context>
chip_gen: v7x
topology: tpu7x:2x2x1
jax: 0.10.0
libtpu: 0.0.40
codegen_flags: <defaults>
</compile_context>

<pallas_src>
import jax
import jax.numpy as jnp
from jax.experimental import pallas as pl
from jax.experimental.pallas import tpu as pltpu


def gated_fusion_kernel(x1_ref, x2_ref, x3_ref, w1_ref, w2_ref, w3_ref,
                        b_ref, o_ref):
    # x*_ref / o_ref: (C, tn)   w*_ref: (C, C)   b_ref: (C, 1) float32
    x1 = x1_ref[...]
    x2 = x2_ref[...]
    x3 = x3_ref[...]

    # conv1x1(cat([x1, x2, x3], C)) == W1 @ x1 + W2 @ x2 + W3 @ x3 + b.
    # MXU operands keep their native dtype (bf16 stays bf16); accumulation is
    # f32 via preferred_element_type.
    s = (jnp.dot(w1_ref[...], x1, preferred_element_type=jnp.float32)
         + jnp.dot(w2_ref[...], x2, preferred_element_type=jnp.float32)
         + jnp.dot(w3_ref[...], x3, preferred_element_type=jnp.float32)
         + b_ref[...])                        # (C, 1) broadcasts over lanes
    # TODO(synk): for the large-C compute-bound regime, stage x1/x2/x3 into a
    # single (3C, tn) VMEM tile and do one K=3C dot to cut MXU push traffic.

    gates = jax.nn.sigmoid(s)                 # EUP exp; free-ish slot

    # gates*x1 + (1-gates)*(x2+x3)  ==  s23 + gates*(x1 - s23)  (fewer VPU ops)
    x1f = x1.astype(jnp.float32)
    s23 = x2.astype(jnp.float32) + x3.astype(jnp.float32)
    out = s23 + gates * (x1f - s23)
    o_ref[...] = out.astype(o_ref.dtype)


def _tpu_vmem_and_dual_tc():
    """(physical VMEM bytes per TensorCore, whether the chip has 2 TCs)."""
    phys = None
    try:
        phys = int(pltpu.get_tpu_info().vmem_capacity_bytes)
    except Exception:
        phys = None
    kind = ""
    try:
        kind = jax.devices()[0].device_kind.lower()
    except Exception:
        pass
    dual_tc = ("v7" in kind) or ("tpu7" in kind)
    if phys is None or phys <= 0:
        phys = (64 if dual_tc else 128) * 1024 * 1024
    return phys, dual_tc


def _choose_tn(hw, per_tn_bytes, tile_budget, min_spatial_tiles):
    """Largest legal spatial (lane) tile that fits the VMEM tile budget.

    Legal tiles are either the full spatial extent or multiples of 128 lanes.
    Preference: (a) full (C, hw) slab (one contiguous DMA per batch element),
    (b) largest 128-multiple dividing hw exactly (unmasked lane-dense stores),
    (c) largest 128-multiple that fits (ragged tail, still correct).
    """
    tn_max = max(128, (tile_budget // max(per_tn_bytes, 1)) // 128 * 128)

    if hw <= tn_max and min_spatial_tiles <= 1:
        return hw

    limit = min(tn_max, hw)
    if min_spatial_tiles > 1:
        if hw >= 256:
            limit = min(limit, hw // 2)       # force >=2 spatial tiles (v7x, n==1)
        elif hw <= tn_max:
            return hw                         # too small to split legally
    limit = max(128, (limit // 128) * 128)

    t = limit
    while t >= 128:
        if hw % t == 0:
            return t
        t -= 128
    return limit


def gated_fusion(x1, x2, x3, weight, bias, *, tn=None):
    """x1/x2/x3: (N, C, H, W) (NCHW, PyTorch convention).
    weight: (C, 3C) -- Conv2d(3C, C, kernel_size=1) weight squeezed.
    bias: (C,).  tn: optional spatial-tile cap (auto-sized when None)."""
    n, c, h, w = x1.shape
    hw = h * w
    itemsize = x1.dtype.itemsize

    # Free reshapes: NCHW already has spatial contiguous & last.
    x1r = x1.reshape(n, c, hw)
    x2r = x2.reshape(n, c, hw)
    x3r = x3.reshape(n, c, hw)

    # Split the concat-weight once in the wrapper; order matches cat([x1,x2,x3]).
    # If activations are bf16, feed bf16 weights to the MXU as well.
    w_dtype = x1.dtype if x1.dtype == jnp.bfloat16 else weight.dtype
    w1 = weight[:, 0:c].astype(w_dtype)
    w2 = weight[:, c:2 * c].astype(w_dtype)
    w3 = weight[:, 2 * c:3 * c].astype(w_dtype)
    b_col = bias.reshape(c, 1).astype(jnp.float32)

    # --- Generation-aware VMEM budget --------------------------------------
    phys_vmem, dual_tc = _tpu_vmem_and_dual_tc()
    # ~72% of physical VMEM (capped): ~46 MiB on v7x (64 MiB physical),
    # ~92 MiB on v5e/v6e (128 MiB).  Passed explicitly as vmem_limit_bytes so
    # the 16/32 MiB default scoped limits don't apply.
    budget = min(int(phys_vmem * 0.72), 96 * 1024 * 1024)
    vmem_limit = int(min(phys_vmem, budget + (4 << 20)))

    # Grid-invariant weights: charged 1x when single-buffered, 2x otherwise.
    weight_vmem = 3 * c * c * w1.dtype.itemsize + c * 4
    single_buffer_weights = weight_vmem >= (2 << 20)
    resident_weight_bytes = weight_vmem * (1 if single_buffer_weights else 2)
    # TODO(synk): for very large C (resident weights > ~half the budget), add an
    # output-channel grid axis that tiles the weight rows instead of keeping all
    # three (C, C) blocks resident.

    # Per-lane VMEM cost of a spatial tile: double-buffered x1/x2/x3/out
    # pipeline buffers plus ~one tile-set of f32 elementwise temporaries.
    per_tn_bytes = 2 * 4 * c * itemsize + 4 * c * 4
    tile_budget = budget - resident_weight_bytes - (1 << 20)   # internal-scratch slack
    tile_budget = max(tile_budget, per_tn_bytes * 128)

    # Dual-TensorCore chips (v7x): make sure the grid has >= 2 steps.
    min_spatial_tiles = 2 if (dual_tc and n < 2) else 1
    tn_eff = _choose_tn(hw, per_tn_bytes, tile_budget, min_spatial_tiles)
    if tn is not None:                                          # optional user cap
        cap = hw if int(tn) >= hw else max(128, (int(tn) // 128) * 128)
        tn_eff = min(tn_eff, cap)

    grid = (n, pl.cdiv(hw, tn_eff))           # ragged tail (if any) masked by Pallas

    x_spec = pl.BlockSpec((None, c, tn_eff), lambda ni, j: (ni, 0, j))
    if single_buffer_weights:
        # Constant index_map -> double-buffering buys nothing; save the VMEM.
        w_spec = pl.BlockSpec((c, c), lambda ni, j: (0, 0),
                              pipeline_mode=pl.Buffered(1))
        b_spec = pl.BlockSpec((c, 1), lambda ni, j: (0, 0),
                              pipeline_mode=pl.Buffered(1))
    else:
        w_spec = pl.BlockSpec((c, c), lambda ni, j: (0, 0))
        b_spec = pl.BlockSpec((c, 1), lambda ni, j: (0, 0))

    cost = pl.CostEstimate(
        flops=int(n * hw * (6 * c * c + 8 * c)),
        transcendentals=int(n * c * hw),
        bytes_accessed=int(4 * n * c * hw * itemsize
                           + 3 * c * c * w1.dtype.itemsize + c * 4),
    )

    out = pl.pallas_call(
        gated_fusion_kernel,
        out_shape=jax.ShapeDtypeStruct((n, c, hw), x1.dtype),
        grid_spec=pltpu.PrefetchScalarGridSpec(
            num_scalar_prefetch=0,
            grid=grid,
            in_specs=[x_spec, x_spec, x_spec, w_spec, w_spec, w_spec, b_spec],
            out_specs=x_spec,
        ),
        compiler_params=pltpu.CompilerParams(
            dimension_semantics=("parallel", "parallel"),
            vmem_limit_bytes=vmem_limit),
        cost_estimate=cost,
    )(x1r, x2r, x3r, w1, w2, w3, b_col)

    return out.reshape(n, c, h, w)


def gated_fusion_ref(x1, x2, x3, weight, bias):
    """Pure-JAX reference mirroring the PyTorch forward (NCHW)."""
    x = jnp.concatenate([x1, x2, x3], axis=1)                 # (N, 3C, H, W)
    conv = jnp.einsum('nchw,oc->nohw', x, weight) + bias[None, :, None, None]
    gates = jax.nn.sigmoid(conv)
    return gates * x1 + (1.0 - gates) * (x2 + x3)


if __name__ == "__main__":
    key = jax.random.PRNGKey(0)
    k1, k2, k3, kw, kb = jax.random.split(key, 5)

    N, C, H, W = 2, 4, 16, 16
    x1 = jax.random.normal(k1, (N, C, H, W), dtype=jnp.float32)
    x2 = jax.random.normal(k2, (N, C, H, W), dtype=jnp.float32)
    x3 = jax.random.normal(k3, (N, C, H, W), dtype=jnp.float32)

    # Deterministic Conv2d(3C, C, kernel_size=1) params (kaiming-uniform-ish)
    fan_in = 3 * C
    bound = 1.0 / (fan_in ** 0.5)
    weight = jax.random.uniform(kw, (C, 3 * C), jnp.float32, -bound, bound)
    bias = jax.random.uniform(kb, (C,), jnp.float32, -bound, bound)

    out = gated_fusion(x1, x2, x3, weight, bias)
    out = jax.block_until_ready(out)

    ref = gated_fusion_ref(x1, x2, x3, weight, bias)
    assert out.shape == (N, C, H, W)
    assert jnp.allclose(out, ref, atol=1e-5, rtol=1e-5)

    print("KERNEL_OK")
</pallas_src>

<mosaic_0001>
module attributes {stable_mosaic.version = 11 : i64} {
  func.func @gated_fusion_kernel(%arg0: i32, %arg1: i32, %arg2: memref<1x4x256xf32, #tpu.memory_space<vmem>>, %arg3: memref<1x4x256xf32, #tpu.memory_space<vmem>>, %arg4: memref<1x4x256xf32, #tpu.memory_space<vmem>>, %arg5: memref<4x4xf32, #tpu.memory_space<vmem>>, %arg6: memref<4x4xf32, #tpu.memory_space<vmem>>, %arg7: memref<4x4xf32, #tpu.memory_space<vmem>>, %arg8: memref<4x1xf32, #tpu.memory_space<vmem>>, %arg9: memref<1x4x256xf32, #tpu.memory_space<vmem>>) attributes {dimension_semantics = [#tpu.dimension_semantics<parallel>, #tpu.dimension_semantics<parallel>], iteration_bounds = array<i64: 2, 1>, scalar_prefetch = 0 : i64, scratch_operands = 0 : i64, tpu.core_type = #tpu.core_type<tc>, window_params = [{transform_indices = @transform_0, window_bounds = array<i64: 1, 4, 256>}, {transform_indices = @transform_1, window_bounds = array<i64: 1, 4, 256>}, {transform_indices = @transform_2, window_bounds = array<i64: 1, 4, 256>}, {pipeline_mode = #tpu.pipeline_mode<synchronous>, transform_indices = @transform_3, window_bounds = array<i64: 4, 4>}, {pipeline_mode = #tpu.pipeline_mode<synchronous>, transform_indices = @transform_4, window_bounds = array<i64: 4, 4>}, {pipeline_mode = #tpu.pipeline_mode<synchronous>, transform_indices = @transform_5, window_bounds = array<i64: 4, 4>}, {pipeline_mode = #tpu.pipeline_mode<synchronous>, transform_indices = @transform_6, window_bounds = array<i64: 4, 1>}, {transform_indices = @transform_7, window_bounds = array<i64: 1, 4, 256>}]} {
    %c0 = arith.constant 0 : index
    %c0_0 = arith.constant 0 : index
    %c0_1 = arith.constant 0 : index
    %0 = vector.load %arg2[%c0, %c0_0, %c0_1] : memref<1x4x256xf32, #tpu.memory_space<vmem>>, vector<1x4x256xf32>
    %1 = vector.shape_cast %0 : vector<1x4x256xf32> to vector<4x256xf32>
    %c0_2 = arith.constant 0 : index
    %c0_3 = arith.constant 0 : index
    %c0_4 = arith.constant 0 : index
    %2 = vector.load %arg3[%c0_2, %c0_3, %c0_4] : memref<1x4x256xf32, #tpu.memory_space<vmem>>, vector<1x4x256xf32>
    %3 = vector.shape_cast %2 : vector<1x4x256xf32> to vector<4x256xf32>
    %c0_5 = arith.constant 0 : index
    %c0_6 = arith.constant 0 : index
    %c0_7 = arith.constant 0 : index
    %4 = vector.load %arg4[%c0_5, %c0_6, %c0_7] : memref<1x4x256xf32, #tpu.memory_space<vmem>>, vector<1x4x256xf32>
    %5 = vector.shape_cast %4 : vector<1x4x256xf32> to vector<4x256xf32>
    %c0_8 = arith.constant 0 : index
    %c0_9 = arith.constant 0 : index
    %6 = vector.load %arg5[%c0_8, %c0_9] : memref<4x4xf32, #tpu.memory_space<vmem>>, vector<4x4xf32>
    %cst = arith.constant dense<0.000000e+00> : vector<4x256xf32>
    %7 = tpu.matmul %6, %1, %cst {dimension_numbers = #tpu.dot_dimension_numbers<[1], [0], [0], [1], [0, 0, 1, 1], [], []>} : vector<4x4xf32>, vector<4x256xf32>, vector<4x256xf32> -> vector<4x256xf32>
    %c0_10 = arith.constant 0 : index
    %c0_11 = arith.constant 0 : index
    %8 = vector.load %arg6[%c0_10, %c0_11] : memref<4x4xf32, #tpu.memory_space<vmem>>, vector<4x4xf32>
    %cst_12 = arith.constant dense<0.000000e+00> : vector<4x256xf32>
    %9 = tpu.matmul %8, %3, %cst_12 {dimension_numbers = #tpu.dot_dimension_numbers<[1], [0], [0], [1], [0, 0, 1, 1], [], []>} : vector<4x4xf32>, vector<4x256xf32>, vector<4x256xf32> -> vector<4x256xf32>
    %10 = arith.addf %7, %9 : vector<4x256xf32>
    %c0_13 = arith.constant 0 : index
    %c0_14 = arith.constant 0 : index
    %11 = vector.load %arg7[%c0_13, %c0_14] : memref<4x4xf32, #tpu.memory_space<vmem>>, vector<4x4xf32>
    %cst_15 = arith.constant dense<0.000000e+00> : vector<4x256xf32>
    %12 = tpu.matmul %11, %5, %cst_15 {dimension_numbers = #tpu.dot_dimension_numbers<[1], [0], [0], [1], [0, 0, 1, 1], [], []>} : vector<4x4xf32>, vector<4x256xf32>, vector<4x256xf32> -> vector<4x256xf32>
    %13 = arith.addf %10, %12 : vector<4x256xf32>
    %c0_16 = arith.constant 0 : index
    %c0_17 = arith.constant 0 : index
    %14 = vector.load %arg8[%c0_16, %c0_17] : memref<4x1xf32, #tpu.memory_space<vmem>>, vector<4x1xf32>
    %15 = vector.broadcast %14 : vector<4x1xf32> to vector<4x256xf32>
    %16 = arith.addf %13, %15 : vector<4x256xf32>
    %17 = arith.negf %16 : vector<4x256xf32>
    %18 = math.exp %17 : vector<4x256xf32>
    %cst_18 = arith.constant 1.000000e+00 : f32
    %19 = vector.broadcast %cst_18 : f32 to vector<4x256xf32>
    %20 = arith.addf %19, %18 : vector<4x256xf32>
    %21 = arith.divf %19, %20 : vector<4x256xf32>
    %22 = arith.addf %3, %5 : vector<4x256xf32>
    %23 = arith.subf %1, %22 : vector<4x256xf32>
    %24 = arith.mulf %21, %23 : vector<4x256xf32>
    %25 = arith.addf %22, %24 : vector<4x256xf32>
    %c0_19 = arith.constant 0 : index
    %c0_20 = arith.constant 0 : index
    %c0_21 = arith.constant 0 : index
    %26 = vector.load %arg9[%c0_19, %c0_20, %c0_21] : memref<1x4x256xf32, #tpu.memory_space<vmem>>, vector<1x4x256xf32>
    %27 = vector.shape_cast %26 : vector<1x4x256xf32> to vector<4x256xf32>
    %28 = vector.shape_cast %25 : vector<4x256xf32> to vector<1x4x256xf32>
    tpu.vector_store %arg9[%c0_19, %c0_20, %c0_21], %28 {strides = array<i32>} : memref<1x4x256xf32, #tpu.memory_space<vmem>>, vector<1x4x256xf32>,
    return
  }
  func.func @transform_0(%arg0: i32, %arg1: i32) -> (i32, i32, i32) {
    %c0_i32 = arith.constant 0 : i32
    %c0_i32_0 = arith.constant 0 : i32
    return %arg0, %c0_i32, %arg1 : i32, i32, i32
  }
  func.func @transform_1(%arg0: i32, %arg1: i32) -> (i32, i32, i32) {
    %c0_i32 = arith.constant 0 : i32
    %c0_i32_0 = arith.constant 0 : i32
    return %arg0, %c0_i32, %arg1 : i32, i32, i32
  }
  func.func @transform_2(%arg0: i32, %arg1: i32) -> (i32, i32, i32) {
    %c0_i32 = arith.constant 0 : i32
    %c0_i32_0 = arith.constant 0 : i32
    return %arg0, %c0_i32, %arg1 : i32, i32, i32
  }
  func.func @transform_3(%arg0: i32, %arg1: i32) -> (i32, i32) {
    %c0_i32 = arith.constant 0 : i32
    %c0_i32_0 = arith.constant 0 : i32
    %c0_i32_1 = arith.constant 0 : i32
    return %c0_i32, %c0_i32_0 : i32, i32
  }
  func.func @transform_4(%arg0: i32, %arg1: i32) -> (i32, i32) {
    %c0_i32 = arith.constant 0 : i32
    %c0_i32_0 = arith.constant 0 : i32
    %c0_i32_1 = arith.constant 0 : i32
    return %c0_i32, %c0_i32_0 : i32, i32
  }
  func.func @transform_5(%arg0: i32, %arg1: i32) -> (i32, i32) {
    %c0_i32 = arith.constant 0 : i32
    %c0_i32_0 = arith.constant 0 : i32
    %c0_i32_1 = arith.constant 0 : i32
    return %c0_i32, %c0_i32_0 : i32, i32
  }
  func.func @transform_6(%arg0: i32, %arg1: i32) -> (i32, i32) {
    %c0_i32 = arith.constant 0 : i32
    %c0_i32_0 = arith.constant 0 : i32
    %c0_i32_1 = arith.constant 0 : i32
    return %c0_i32, %c0_i32_0 : i32, i32
  }
  func.func @transform_7(%arg0: i32, %arg1: i32) -> (i32, i32, i32) {
    %c0_i32 = arith.constant 0 : i32
    %c0_i32_0 = arith.constant 0 : i32
    return %arg0, %c0_i32, %arg1 : i32, i32, i32
  }
}

</mosaic_0001>

<bundles_post_ra>
// kernel: tpu_custom_call.1
= control target key start
LH: loop header
LB: loop body
LE: loop exit
PB: predicated region body
PF: predicated region fallthrough
CT: control target
= control target key end

     0   :  { %s1816_s0 = inlined_call_operand.hbm [shape: f32[2,4,256], index: 0, kind: input, shape index: {}]   ;;  %s1817_s1 = inlined_call_operand.hbm [shape: f32[2,4,256], index: 1, kind: input, shape index: {}]   ;;  %s1818_s2 = inlined_call_operand.hbm [shape: f32[2,4,256], index: 2, kind: input, shape index: {}]   ;;  %s1819_s3 = inlined_call_operand.hbm [shape: f32[4,4], index: 3, kind: input, shape index: {}]   ;;  %s1820_s4 = inlined_call_operand.hbm [shape: f32[4,4], index: 4, kind: input, shape index: {}]   ;;  %s1821_s5 = inlined_call_operand.hbm [shape: f32[4,4], index: 5, kind: input, shape index: {}]   ;;  %s1822_s6 = inlined_call_operand.hbm [shape: f32[4,1], index: 6, kind: input, shape index: {}]   ;;  %s1823_s7 = inlined_call_operand.hbm [shape: f32[2,4,256], index: 7, kind: output, shape index: {}]  }
   0x1   :  { %1844 = sst [smem:[#allocation26_spill]] %s1817_s1 }
   0x2   :  { %1845 = sst [smem:[#allocation27_spill]] %s1819_s3 }
   0x3   :  { %1846 = sst [smem:[#allocation28_spill]] %s1821_s5 }
   0x4   :  { %1847 = sst [smem:[#allocation29_spill]] %s1823_s7 }
   0x5   :  { %12 = vsyncpa [#allocation3], 0 }
   0x6   :  { %14 = vsyncpa [#allocation3 + $0x1], 0 }
   0x7   :  { %15 = vsyncpa [#allocation6], 0 }
   0x8   :  { %17 = vsyncpa [#allocation6 + $0x1], 0 }
   0x9   :  { %18 = vsyncpa [#allocation9], 0 }
   0xa   :  { %19 = vsyncpa [#allocation12], 0 }
   0xb   :  { %20 = vsyncpa [#allocation4], 0 }
   0xc   :  { %22 = vsyncpa [#allocation4 + $0x1], 0  ;;  %s1444_s24 = smov 0   ;;  %s1446_s25 = smov 0  }
   0xd   :  { %s1448_s26 = smov 0   ;;  %s1450_s27 = smov 0  }
   0xe   :  { %s1452_s28 = smov 0   ;;  %s1454_s29 = smov 0  }
   0xf LB: > { %1848 = sst [smem:[#allocation20_spill]] %s1372_s24  ;;  %s1475_s30 = sadd.s32 4294967295, %s1392_s29   ;;  %s1392_s29 = sphi %s1454_s29, %s28_s29   ;;  %s1388_s28 = sphi %s1452_s28, %s1888_s28   ;;  %s1384_s27 = sphi %s1450_s27, %s1887_s27   ;;  %s1380_s26 = sphi %s1448_s26, %s1891_s26   ;;  %s1376_s25 = sphi %s1446_s25, %s1890_s25   ;;  %s1372_s24 = sphi %s1444_s24, %s1889_s24  }
  0x10   : > { %1849 = sst [smem:[#allocation21_spill]] %s1388_s28  ;;  %p921_p0 = scmp.ge.s32.totalorder %s1392_s29, 1 }
  0x11   : > { %1850 = sst [smem:[#allocation22_spill]] %s1392_s29  ;;  %p1824_p1 = scmp.eq.s32.totalorder %s1475_s30, 0 }
  0x12   : > { %p241_p2 = scmp.lt.s32.totalorder %s1392_s29, 3  ;;  %s1394_s9 = smov [#allocation8]  }
  0x13   : > { %s254_s10 = sshll.u32 %s1394_s9, 4  ;;  %s1395_s11 = smov [#allocation11]   ;;  %s255_s10 = int_to_ptr.vmem [resolvable:$true] %s254_s10 }
  0x14   : > { %p1480_p3 = pnand %p921_p0, %p241_p2  ;;  %s276_s12 = sshll.u32 %s1395_s11, 4  ;;  %s1493_s12 = int_to_ptr.vmem [resolvable:$true] %s276_s12 }
  0x15   : > { %s1853_s3 = sld [smem:[#allocation27_spill]] }
  0x16   : > { %s1851_s8 = scalar_select %p1480_p3, 1, 0 }
  0x17   : > { %p993_p5 = pneg %p1480_p3 }
  0x19   : > { %p1489_p6 = pnand %p993_p5, %p1824_p1 }
  0x1b   : > { %s1852_s13 = scalar_select %p1489_p6, 1, 0 }
  0x1c   : > { %s1096_s16 = scalar_lea.hbm %s1853_s3, 64  ;;  %p1503_p8 = pneg %p1489_p6 }
  0x1d   : > { %p1097_p7 = scmp.ne.s32.totalorder %s1853_s3, %s1096_s16  ;;  %p1103_p11 = scmp.lt.u32.totalorder %s1096_s16, %s1853_s3 }
  0x1e   : > { %s1854_s19 = scalar_select %p1503_p8, 1, 0 }
  0x1f   : > { %p1099_p9 = pnand %p1503_p8, %p1097_p7 }
  0x21   : > { %p1100_p10 = pneg %p1099_p9 }
  0x23   : > { %p1105_p12 = pnand %p1103_p11, %p1100_p10 }
  0x25   : > { %1108 = shalt.err (!%p1105_p12)
}
  0x26   : > { %s1109_s22 = scalar_lea.vmem %s255_s10, 64  ;;  %p1117_p5 = scmp.lt.s32.totalorder %s255_s10, %s255_s10 }
  0x27   : > { %p1110_p13 = scmp.ne.s32.totalorder %s255_s10, %s1109_s22  ;;  %p1118_p4 = scmp.lt.s32.totalorder %s1109_s22, %s1109_s22 }
  0x29   : > { %p1112_p0 = pnand %p1110_p13, %p1503_p8  ;;  %p1119_p1 = por %p1118_p4, %p1117_p5 }
  0x2b   : > { %p1113_p2 = pneg %p1112_p0 }
  0x2d   : > { %p1120_p3 = pnand %p1119_p1, %p1113_p2 }
  0x2f   : > { %1123 = shalt.err (!%p1120_p3)
}
  0x30   : > { %996 = dma.hbm_to_vmem [thread:$0]  (!%p1489_p6), %s1853_s3, 64, %s255_s10, [#allocation9]  }
  0x31   : > { %s1855_s5 = sld [smem:[#allocation28_spill]] }
  0x37   : > { %s1124_s15 = scalar_lea.hbm %s1855_s5, 64 }
  0x38   : > { %p1125_p7 = scmp.ne.s32.totalorder %s1855_s5, %s1124_s15  ;;  %p1131_p1 = scmp.lt.u32.totalorder %s1124_s15, %s1855_s5 }
  0x3a   : > { %p1127_p9 = pnand %p1125_p7, %p1503_p8 }
  0x3c   : > { %p1128_p4 = pneg %p1127_p9 }
  0x3e   : > { %p1133_p3 = pnand %p1131_p1, %p1128_p4 }
  0x40   : > { %1136 = shalt.err (!%p1133_p3)
}
  0x41   : > { %s1137_s10 = scalar_lea.vmem %s1493_s12, 64  ;;  %p1145_p13 = scmp.lt.s32.totalorder %s1493_s12, %s1493_s12 }
  0x42   : > { %p1138_p10 = scmp.ne.s32.totalorder %s1493_s12, %s1137_s10  ;;  %p1146_p0 = scmp.lt.s32.totalorder %s1137_s10, %s1137_s10 }
  0x44   : > { %p1140_p11 = pnand %p1138_p10, %p1503_p8  ;;  %p1147_p2 = por %p1146_p0, %p1145_p13 }
  0x46   : > { %p1141_p12 = pneg %p1140_p11 }
  0x48   : > { %p1148_p5 = pnand %p1147_p2, %p1141_p12 }
  0x4a   : > { %1151 = shalt.err (!%p1148_p5)
}
  0x4b   : > { %1002 = dma.hbm_to_vmem [thread:$0]  (!%p1489_p6), %s1855_s5, 64, %s1493_s12, [#allocation12]  }
  0x4c   : > { %s920_s23 = sadd.s32 4294967294, %s1392_s29   ;;  %s40_s9 = sadd.s32 1, %s1388_s28 }
  0x4d   : > { %p42_p7 = scmp.ge.s32.totalorder %s40_s9, 2  ;;  %s49_s11 = sadd.s32 1, %s1380_s26 }
  0x4e   : > { %p56_p9 = scmp.ne.s32.totalorder %s1380_s26, %s1376_s25  ;;  %p57_p4 = scmp.eq.s32.totalorder %s1392_s29, 0 }
  0x4f   : > { %s1893_s9 = smov (%p42_p7, %s40_s9), 0  ;;  %p62_p3 = scmp.ne.s32.totalorder %s1376_s25, %s1372_s24 }
  0x50   : > { %1856 = sst [smem:[#allocation23_spill]] %s1893_s9  ;;  %p1550_p1 = por %p57_p4, %p56_p9 }
  0x51   : > { %s44_s12 = ssub.s32 %s1388_s28, %s1893_s9  ;;  %p228_p10 = scmp.eq.s32.totalorder %s1475_s30, 1 }
  0x52   : > { %p47_p11 = scmp.eq.s32.totalorder %s44_s12, 0  ;;  %p1858_p12 = scmp.eq.s32.totalorder %s1475_s30, 0 }
  0x53   : > { %p1565_p0 = por %p228_p10, %p56_p9  ;;  %p234_p2 = scmp.eq.s32.totalorder %s920_s23, 1 }
  0x54   : > { %p1561_p13 = por %p1858_p12, %p62_p3  ;;  %p1024_p7 = scmp.lt.s32.totalorder %s1392_s29, 2 }
  0x55   : > { %s1860_s16 = scalar_select %p1565_p0, 1, 0 }
  0x56   : > { %s1859_s15 = scalar_select %p1561_p13, 1, 0 }
  0x57   : > { %s1570_s17 = scalar_select %p47_p11, %s1380_s26, %s49_s11  }
  0x58   : > { %p1572_p5 = por %p234_p2, %p62_p3  ;;  %s1826_s20 = sand.u32 1, %s1380_s26  }
  0x59   : > { %1861 = sst [smem:[#allocation24_spill]] %s1570_s17  ;;  %s1579_s10 = sshll.u32 %s1388_s28, 7 }
  0x5a   : > { %s1862_s18 = scalar_select %p1572_p5, 1, 0 }
  0x5b   : > { %s1583_s21 = sshll.u32 %s1826_s20, 3  ;;  %p1587_p9 = pnand %p1024_p7, %p1550_p1 }
  0x5c   : > { %1863 = sst [smem:[#allocation25_spill]] %s1862_s18  ;;  %s319_s23 = sand.u32 1, %s1392_s29  }
  0x5d   : > { %s1864_s22 = scalar_select %p1587_p9, 1, 0 }
  0x5e   : > { %s1865_s1 = sld [smem:[#allocation26_spill]]  ;;  %s323_s5 = scalar_lea.vmem [#allocation5], %s1583_s21 }
  0x5f   : > { %s333_s20 = sshll.u32 %s323_s5, 4  ;;  %s1601_s14 = scalar_lea.sflag [#allocation6], %s319_s23  ;;  %s1599_s20 = int_to_ptr.vmem [resolvable:$true] %s333_s20 }
  0x60   : > { %p1607_p1 = pneg %p1587_p9 }
  0x62   : > { %s1866_s28 = scalar_select %p1607_p1, 1, 0 }
  0x64   : > { %s1596_s3 = scalar_lea.hbm %s1865_s1, %s1579_s10  ;;  %s1157_s17 = scalar_lea.hbm %s1865_s1, 256 }
  0x65   : > { %s1152_s9 = scalar_lea.hbm %s1596_s3, 128  ;;  %p1158_p11 = scmp.lt.u32.totalorder %s1596_s3, %s1865_s1 }
  0x66   : > { %p1153_p4 = scmp.ne.s32.totalorder %s1596_s3, %s1152_s9  ;;  %p1159_p12 = scmp.lt.u32.totalorder %s1157_s17, %s1152_s9 }
  0x67   : > { %p1161_p7 = scmp.lt.u32.totalorder %s1152_s9, %s1596_s3 }
  0x68   : > { %p1155_p3 = pnand %p1607_p1, %p1153_p4  ;;  %p1160_p2 = por %p1159_p12, %p1158_p11 }
  0x6a   : > { %p1156_p10 = pneg %p1155_p3  ;;  %p1162_p5 = por %p1161_p7, %p1160_p2 }
  0x6c   : > { %p1163_p0 = pnand %p1162_p5, %p1156_p10 }
  0x6e   : > { %1166 = shalt.err (!%p1163_p0)
}
  0x6f   : > { %s1167_s23 = scalar_lea.vmem %s1599_s20, 128  ;;  %s1396_s11 = smov [#allocation5]  }
  0x70   : > { %p1168_p4 = scmp.ne.s32.totalorder %s1599_s20, %s1167_s23  ;;  %s1172_s12 = sshll.u32 %s1396_s11, 4  ;;  %s1173_s12 = int_to_ptr.vmem [resolvable:$false] %s1172_s12 }
  0x71   : > { %s1174_s29 = scalar_lea.vmem %s1173_s12, 256  ;;  %p1175_p6 = scmp.lt.s32.totalorder %s1599_s20, %s1173_s12 }
  0x72   : > { %p1170_p3 = pnand %p1168_p4, %p1607_p1  ;;  %p1176_p8 = scmp.lt.s32.totalorder %s1174_s29, %s1167_s23 }
  0x74   : > { %p1171_p13 = pneg %p1170_p3  ;;  %p1177_p11 = por %p1176_p8, %p1175_p6 }
  0x76   : > { %p1178_p12 = pnand %p1177_p11, %p1171_p13 }
  0x78   : > { %1181 = shalt.err (!%p1178_p12)
}
  0x79   : > { %1012 = dma.hbm_to_vmem [thread:$0]  (!%p1587_p9), %s1596_s3, 128, %s1599_s20, %s1601_s14  }
  0x7a   : > { %s1397_s9 = smov [#allocation10]   ;;  %s1398_s5 = smov [#allocation13]  }
  0x7b   : > { %s265_s17 = sshll.u32 %s1397_s9, 4  ;;  %s287_s1 = sshll.u32 %s1398_s5, 4  ;;  %s266_s17 = int_to_ptr.vmem [resolvable:$true] %s265_s17  ;;  %s288_s1 = int_to_ptr.vmem [resolvable:$true] %s287_s1 }
  0x7c   : > { %s1182_s12 = scalar_lea.hbm %s1820_s4, 64  ;;  %p1867_p8 = scmp.ne.s32.totalorder %s1854_s19, 0 }
  0x7d   : > { %p1183_p6 = scmp.ne.s32.totalorder %s1820_s4, %s1182_s12  ;;  %p1189_p5 = scmp.lt.u32.totalorder %s1182_s12, %s1820_s4 }
  0x7f   : > { %p1185_p13 = pnand %p1183_p6, %p1867_p8 }
  0x81   : > { %p1186_p0 = pneg %p1185_p13 }
  0x83   : > { %p1191_p10 = pnand %p1189_p5, %p1186_p0 }
  0x85   : > { %1194 = shalt.err (!%p1191_p10)
}
  0x86   : > { %s1195_s3 = scalar_lea.vmem %s266_s17, 64  ;;  %p1203_p3 = scmp.lt.s32.totalorder %s266_s17, %s266_s17 }
  0x87   : > { %p1196_p2 = scmp.ne.s32.totalorder %s266_s17, %s1195_s3  ;;  %p1204_p11 = scmp.lt.s32.totalorder %s1195_s3, %s1195_s3 }
  0x89   : > { %p1198_p7 = pnand %p1196_p2, %p1867_p8  ;;  %p1205_p12 = por %p1204_p11, %p1203_p3 }
  0x8b   : > { %p1199_p4 = pneg %p1198_p7 }
  0x8d   : > { %p1206_p9 = pnand %p1205_p12, %p1199_p4 }
  0x8f   : > { %1209 = shalt.err (!%p1206_p9)
}
  0x90   : > { %p1868_p6 = scmp.ne.s32.totalorder %s1852_s13, 0  ;;  %s1210_s9 = scalar_lea.hbm %s1822_s6, 64 }
  0x91   : > { %p1211_p13 = scmp.ne.s32.totalorder %s1822_s6, %s1210_s9  ;;  %p1217_p9 = scmp.lt.u32.totalorder %s1210_s9, %s1822_s6 }
  0x92   : > { %999 = dma.hbm_to_vmem [thread:$0]  (!%p1868_p6), %s1820_s4, 64, %s266_s17, [#allocation9]  }
  0x93   : > { %p1213_p0 = pnand %p1211_p13, %p1867_p8 }
  0x95   : > { %p1214_p5 = pneg %p1213_p0 }
  0x97   : > { %p1219_p10 = pnand %p1217_p9, %p1214_p5 }
  0x99   : > { %1222 = shalt.err (!%p1219_p10)
}
  0x9a   : > { %s1223_s29 = scalar_lea.vmem %s288_s1, 64  ;;  %p1231_p3 = scmp.lt.s32.totalorder %s288_s1, %s288_s1 }
  0x9b   : > { %p1224_p2 = scmp.ne.s32.totalorder %s288_s1, %s1223_s29  ;;  %p1232_p11 = scmp.lt.s32.totalorder %s1223_s29, %s1223_s29 }
  0x9d   : > { %p1226_p7 = pnand %p1224_p2, %p1867_p8  ;;  %p1233_p12 = por %p1232_p11, %p1231_p3 }
  0x9f   : > { %p1227_p4 = pneg %p1226_p7 }
  0xa1   : > { %p1234_p1 = pnand %p1233_p12, %p1227_p4 }
  0xa3   : > { %1237 = shalt.err (!%p1234_p1)
}
  0xa4   : > { %1005 = dma.hbm_to_vmem [thread:$0]  (!%p1868_p6), %s1822_s6, 64, %s288_s1, [#allocation12]  }
  0xa5   : > { %s1671_s20 = scalar_lea.hbm %s1816_s0, %s1579_s10  ;;  %s302_s7 = scalar_lea.vmem [#allocation2], %s1583_s21 }
  0xa6   : > { %s312_s13 = sshll.u32 %s302_s7, 4  ;;  %s1680_s5 = scalar_lea.hbm %s1818_s2, %s1579_s10  ;;  %s1674_s13 = int_to_ptr.vmem [resolvable:$true] %s312_s13 }
  0xa7   : > { %s1869_s11 = sand.u32 1, %s1380_s26   ;;  %s1238_s12 = scalar_lea.hbm %s1671_s20, 128 }
  0xa8   : > { %s299_s1 = scalar_lea.sflag [#allocation3], %s1869_s11  ;;  %p1239_p1 = scmp.ne.s32.totalorder %s1671_s20, %s1238_s12 }
  0xa9   : > { %p1870_p8 = scmp.ne.s32.totalorder %s1866_s28, 0  ;;  %s1243_s17 = scalar_lea.hbm %s1816_s0, 256 }
  0xaa   : > { %p1244_p0 = scmp.lt.u32.totalorder %s1671_s20, %s1816_s0  ;;  %p1245_p5 = scmp.lt.u32.totalorder %s1243_s17, %s1238_s12 }
  0xab   : > { %p1241_p6 = pnand %p1239_p1, %p1870_p8  ;;  %p1247_p10 = scmp.lt.u32.totalorder %s1238_s12, %s1671_s20 }
  0xac   : > { %p1246_p9 = por %p1245_p5, %p1244_p0 }
  0xad   : > { %p1242_p13 = pneg %p1241_p6 }
  0xae   : > { %p1248_p2 = por %p1247_p10, %p1246_p9 }
  0xb0   : > { %p1249_p7 = pnand %p1248_p2, %p1242_p13 }
  0xb2   : > { %1252 = shalt.err (!%p1249_p7)
}
  0xb3   : > { %s1253_s10 = scalar_lea.vmem %s1674_s13, 128  ;;  %s1399_s19 = smov [#allocation2]  }
  0xb4   : > { %p1254_p4 = scmp.ne.s32.totalorder %s1674_s13, %s1253_s10  ;;  %s1258_s7 = sshll.u32 %s1399_s19, 4  ;;  %s1259_s7 = int_to_ptr.vmem [resolvable:$false] %s1258_s7 }
  0xb5   : > { %s1260_s24 = scalar_lea.vmem %s1259_s7, 256  ;;  %p1261_p12 = scmp.lt.s32.totalorder %s1674_s13, %s1259_s7 }
  0xb6   : > { %p1256_p3 = pnand %p1254_p4, %p1870_p8  ;;  %p1262_p1 = scmp.lt.s32.totalorder %s1260_s24, %s1253_s10 }
  0xb8   : > { %p1257_p11 = pneg %p1256_p3  ;;  %p1263_p6 = por %p1262_p1, %p1261_p12 }
  0xba   : > { %p1264_p0 = pnand %p1263_p6, %p1257_p11 }
  0xbc   : > { %1267 = shalt.err (!%p1264_p0)
}
  0xbd   : > { %p1871_p13 = scmp.ne.s32.totalorder %s1864_s22, 0  ;;  %s344_s9 = scalar_lea.vmem [#allocation7], %s1583_s21 }
  0xbe   : > { %s354_s11 = sshll.u32 %s344_s9, 4  ;;  %s1268_s12 = scalar_lea.hbm %s1680_s5, 128  ;;  %s355_s11 = int_to_ptr.vmem [resolvable:$true] %s354_s11 }
  0xbf   : > { %1009 = dma.hbm_to_vmem [thread:$0]  (!%p1871_p13), %s1671_s20, 128, %s1674_s13, %s299_s1  }
  0xc0   : > { %p1269_p5 = scmp.ne.s32.totalorder %s1680_s5, %s1268_s12  ;;  %s1273_s17 = scalar_lea.hbm %s1818_s2, 256 }
  0xc1   : > { %p1274_p2 = scmp.lt.u32.totalorder %s1680_s5, %s1818_s2  ;;  %p1275_p7 = scmp.lt.u32.totalorder %s1273_s17, %s1268_s12 }
  0xc2   : > { %p1271_p9 = pnand %p1269_p5, %p1870_p8  ;;  %p1277_p3 = scmp.lt.u32.totalorder %s1268_s12, %s1680_s5 }
  0xc3   : > { %p1276_p4 = por %p1275_p7, %p1274_p2 }
  0xc4   : > { %p1272_p10 = pneg %p1271_p9 }
  0xc5   : > { %p1278_p11 = por %p1277_p3, %p1276_p4 }
  0xc7   : > { %p1279_p12 = pnand %p1278_p11, %p1272_p10 }
  0xc9   : > { %1282 = shalt.err (!%p1279_p12)
}
  0xca   : > { %s1283_s21 = scalar_lea.vmem %s355_s11, 128  ;;  %s1400_s20 = smov [#allocation7]  }
  0xcb   : > { %p1284_p1 = scmp.ne.s32.totalorder %s355_s11, %s1283_s21  ;;  %s1288_s13 = sshll.u32 %s1400_s20, 4  ;;  %s1289_s13 = int_to_ptr.vmem [resolvable:$false] %s1288_s13 }
  0xcc   : > { %s1290_s1 = scalar_lea.vmem %s1289_s13, 256  ;;  %p1291_p5 = scmp.lt.s32.totalorder %s355_s11, %s1289_s13 }
  0xcd   : > { %p1286_p6 = pnand %p1284_p1, %p1870_p8  ;;  %p1292_p9 = scmp.lt.s32.totalorder %s1290_s1, %s1283_s21 }
  0xcf   : > { %p1287_p0 = pneg %p1286_p6  ;;  %p1293_p13 = por %p1292_p9, %p1291_p5 }
  0xd1   : > { %p1294_p2 = pnand %p1293_p13, %p1287_p0 }
  0xd3   : > { %1297 = shalt.err (!%p1294_p2)
}
  0xd4   : > { %p1872_p7 = scmp.ne.s32.totalorder %s1864_s22, 0  ;;  %p1873_p10 = scmp.ne.s32.totalorder %s1851_s8, 0 }
  0xd5   : > { %s1727_s28 = sand.u32 (!%p1873_p10), 1, %s1376_s25   ;;  %p1874_p8 = scmp.ne.s32.totalorder (!%p1873_p10), %s1859_s15, 0 }
  0xd6   : > { %1015 = dma.hbm_to_vmem [thread:$0]  (!%p1872_p7), %s1680_s5, 128, %s355_s11, %s1601_s14  }
  0xd7   : > { %363 = sbr.rel (%p1873_p10) target bundleno = 509 (0x1fd), region = 48  ;;  %s1730_s10 = sshll.u32 (!%p1873_p10), %s1727_s28, 3 }
  0xd8   : > { %s366_s19 = scalar_lea.sflag (!%p1873_p10), [#allocation3], %s1727_s28  ;;  %s369_s7 = scalar_lea.vmem (!%p1873_p10), [#allocation2], %s1730_s10 }
  0xde   : > { %1351 = dma.done.wait (%p1874_p8), %s366_s19, 128  }
  0xdf   : > { %1353 = vsyncadd (%p1874_p8), %s366_s19, 4294967168  ;;  %s374_s8 = sand.u32 1, %s1475_s30   ;;  %s378_s14 = scalar_lea.vmem [#allocation5], %s1730_s10 }
  0xe0   : > { %s375_s22 = scalar_lea.sflag [#allocation6], %s374_s8 }
  0xe1   : > { %1355 = dma.done.wait (%p1874_p8), %s375_s22, 256  }
  0xe2   : > { %1357 = vsyncadd (%p1874_p8), %s375_s22, 4294967040  ;;  %s387_s5 = scalar_lea.vmem [#allocation7], %s1730_s10  ;;  %p1875_p13 = scmp.eq.s32.totalorder %s1475_s30, 0 }
  0xe4   : > { %1359 = dma.done.wait (%p1875_p13), [#allocation9], 128   ;;  %p1876_p4 = pmov %p1875_p13 }
  0xe6   : > { %1361 = vsyncadd (%p1876_p4), [#allocation9], 4294967168  ;;  %p1877_p3 = pmov %p1876_p4 }
  0xe8   : > { %1363 = dma.done.wait (%p1877_p3), [#allocation12], 128   ;;  %p1878_p11 = pmov %p1877_p3 }
  0xe9   : > { %v1401_v0 = vmov 0.0   ;;  %v1402_v1 = vmov 0   ;;  %v448_v2 = vld [vmem:[%s369_s7] sm:$0xff]  ;;  %vm459_vm0 = vcmask 1043456   ;;  %v449_v6 = vld [vmem:[%s378_s14] sm:$0xff]  ;;  %vm455_vm1 = vcmask 31744  }
  0xea   : > { %1365 = vsyncadd (%p1878_p11), [#allocation12], 4294967168  ;;  %608 = vmatprep.mubr.f32.mxu0 %v1401_v0  ;;  %528 = vmatprep.mubr.f32.mxu1 %v1401_v0  ;;  %v450_v3 = vld [vmem:[%s387_s5] sm:$0xff]  ;;  %v536_v4 = vcombine.high %v448_v2, %v448_v2  ;;  %v451_v7 = vld [vmem:[#allocation8] sm:$0xf]  ;;  %v454_v8 = vcombine.high %v449_v6, %v449_v6  ;;  %s964_s30 = sshll.u32 %s1384_s27, 7 }
  0xeb   : > { %1084 = vset.pattern.permute.xlu0 %v1402_v1  ;;  %v617_v5 = vcombine.high %v450_v3, %v450_v3  ;;  %v718_v9 = vadd.f32 %v450_v3, %v449_v6  ;;  %v698_v10 = vld [vmem:[#allocation13] sm:$0xf]  ;;  %v452_v12 = vld [vmem:[#allocation10] sm:$0xf]  ;;  %v615_v13 = vld [vmem:[#allocation11] sm:$0xf] }
  0xec   : > { %948 = vmatprep.subr.msk.mxu0 %vm459_vm0, %v536_v4  ;;  %701 = vperm.xlu0 %1084, %v698_v10   ;;  %s443_s15 = scalar_lea.vmem [#allocation14], %s1730_s10  ;;  %s1879_s12 = sld [smem:[#allocation29_spill]] }
  0xed   : > { %949 = vmatpush1.msk.msra.mxu0 %vm459_vm0, %v448_v2  ;;  %945 = vmatprep.subr.msk.mxu1 %vm459_vm0, %v454_v8  ;;  %v719_v11 = vsub.f32 %v448_v2, %v718_v9  ;;  %s748_s24 = sshll.u32 %s443_s15, 4  ;;  %s732_s29 = scalar_lea.sflag [#allocation4], %s1727_s28  ;;  %s1769_s24 = int_to_ptr.vmem [resolvable:$true] %s748_s24 }
  0xee   : > { %950 = vmatmul.mubr.msk.f32.vlgmr.msra.gmra.mrb[0].mxu0 %vm455_vm1, %v451_v7  ;;  %951 = vmatprep.subr.msk.mxu0 %vm459_vm0, %v617_v5  ;;  %s1298_s17 = scalar_lea.vmem %s1769_s24, 128  ;;  %p1880_p1 = scmp.ne.s32.totalorder %s1860_s16, 0 }
  0xef   : > { %952 = vmatpush1.msk.msra.mxu0 %vm459_vm0, %v450_v3  ;;  %946 = vmatpush1.msk.msra.mxu1 %vm459_vm0, %v449_v6  ;;  %v721_v29 = vcombine.high %v719_v11, %v719_v11  ;;  %p1299_p12 = scmp.ne.s32.totalorder %s1769_s24, %s1298_s17  ;;  %s1403_s27 = smov [#allocation14]  }
  0xf0   : > { %689 = vmatprep.mubr.f32.mxu0 %v1401_v0  ;;  %947 = vmatmul.mubr.msk.f32.vlgmr.msra.gmra.mrb[0].mxu1 %vm455_vm1, %v452_v12  ;;  %s1302_s3 = sshll.u32 %s1403_s27, 4  ;;  %s1303_s3 = int_to_ptr.vmem [resolvable:$false] %s1302_s3 }
  0xf1   : > { %p1300_p6 = pnand %p1299_p12, %p1880_p1  ;;  %s1304_s18 = scalar_lea.vmem %s1303_s3, 256 }
  0xf2   : > { %s1767_s23 = scalar_lea.hbm %s1879_s12, %s964_s30  ;;  %p1305_p5 = scmp.lt.s32.totalorder %s1769_s24, %s1303_s3 }
  0xf3   : > { %p1301_p0 = pneg %p1300_p6  ;;  %p1306_p9 = scmp.lt.s32.totalorder %s1304_s18, %s1298_s17 }
  0xf5   : > { %p1307_p2 = por %p1306_p9, %p1305_p5 }
  0xf6   : > { %953 = vmatmul.mubr.msk.f32.vlgmr.msra.gmra.mrb[0].mxu0 %vm455_vm1, %v615_v13 }
  0xf7   : > { %p1308_p7 = pnand %p1307_p2, %p1301_p0 }
 0x16b   : > { %v702_v17 = vpop.permute.xlu0 %701 }
 0x1c3   : > { %v530_v14 = vpop.f32.mrb[0].mxu1 }
 0x1c4   : > { %v532_v15 = vpop.f32.mrb[1].mxu1 }
 0x1c9   : > { %v691_v16 = vpop.f32.mrb[0].mxu0 }
 0x1ca   : > { %v965_v18 = vadd.f32 %v691_v16, %v530_v14  ;;  %v693_v19 = vpop.f32.mrb[1].mxu0 }
 0x1cb   : > { %v966_v20 = vadd.f32 %v693_v19, %v532_v15 }
 0x1cc   : > { %v704_v21 = vadd.f32 %v965_v18, %v702_v17 }
 0x1cd   : > { %v705_v22 = vadd.f32 %v966_v20, %v702_v17 }
 0x1ce   : > { %v954_v23 = vmul.f32 -1.442695, %v704_v21 }
 0x1cf   : > { %v955_v24 = vmul.f32 -1.442695, %v705_v22 }
 0x1d0   : > { %1088 = vpow2.f32 %v954_v23 }
 0x1d1   : > { %1090 = vpow2.f32 %v955_v24 }
 0x1da   : > { %v1089_v25 = vpop.eup %1088 }
 0x1db   : > { %v1091_v26 = vpop.eup %1090  ;;  %v712_v27 = vadd.f32 1.0, %v1089_v25 }
 0x1dc   : > { %v713_v28 = vadd.f32 1.0, %v1091_v26 }
 0x1dd   : > { %1092 = vrcp.f32 %v712_v27 }
 0x1de   : > { %1094 = vrcp.f32 %v713_v28 }
 0x1e7   : > { %v1093_v30 = vpop.eup %1092 }
 0x1e8   : > { %v1095_v31 = vpop.eup %1094  ;;  %v723_v32 = vmul.f32 %v1093_v30, %v719_v11 }
 0x1e9   : > { %v724_v33 = vmul.f32 %v1095_v31, %v721_v29 }
 0x1eb   : > { %v727_v34 = vcombine.low %v723_v32, %v724_v33 }
 0x1ed   : > { %v729_v35 = vadd.f32 %v727_v34, %v718_v9 }
 0x1ef   : > { %730 = vst [vmem:[%s443_s15] sm:$0xff] %v729_v35 }
 0x1f0   : > { %1311 = shalt.err (!%p1308_p7)
}
 0x1f1   : > { %s1312_s21 = scalar_lea.hbm %s1767_s23, 128  ;;  %s1316_s1 = scalar_lea.hbm %s1879_s12, 256 }
 0x1f2   : > { %p1313_p10 = scmp.ne.s32.totalorder %s1767_s23, %s1312_s21  ;;  %p1317_p4 = scmp.lt.u32.totalorder %s1767_s23, %s1879_s12 }
 0x1f3   : > { %p1318_p3 = scmp.lt.u32.totalorder %s1316_s1, %s1312_s21  ;;  %p1320_p12 = scmp.lt.u32.totalorder %s1312_s21, %s1767_s23 }
 0x1f4   : > { %p1314_p8 = pnand %p1313_p10, %p1880_p1 }
 0x1f5   : > { %p1319_p11 = por %p1318_p3, %p1317_p4 }
 0x1f6   : > { %p1315_p13 = pneg %p1314_p8 }
 0x1f7   : > { %p1321_p6 = por %p1320_p12, %p1319_p11 }
 0x1f9   : > { %p1322_p0 = pnand %p1321_p6, %p1315_p13 }
 0x1fb   : > { %1325 = shalt.err (!%p1322_p0)
}
 0x1fc   : > { %991 = dma.vmem_to_hbm [thread:$0]  (%p1880_p1), %s1769_s24, 128, %s1767_s23, %s732_s29  }
 0x1fd PF: > { %s1881_s19 = sld [smem:[#allocation20_spill]]  ;;  %s1882_s7 = sld [smem:[#allocation25_spill]] }
 0x1fe   : > { %s1883_s8 = sld [smem:[#allocation22_spill]] }
 0x203   : > { %s760_s22 = sand.u32 1, %s1881_s19   ;;  %p1884_p5 = scmp.ne.s32.totalorder %s1882_s7, 0 }
 0x204   : > { %p1885_p9 = scmp.ge.s32.totalorder %s1883_s8, 2  ;;  %s761_s14 = scalar_lea.sflag [#allocation4], %s760_s22 }
 0x206   : > { %p1017_p2 = pnand %p1885_p9, %p1884_p5 }
 0x208   : > { %1367 = dma.done.wait (!%p1017_p2), %s761_s14, 128  }
 0x209   : > { %1369 = vsyncadd (!%p1017_p2), %s761_s14, 4294967168  ;;  %s28_s29 = sadd.s32 1, %s1883_s8   ;;  %s1886_s16 = sld [smem:[#allocation24_spill]] }
 0x20a   : > { %p25_p7 = scmp.ge.s32.totalorder %s28_s29, 4   ;;  %s1887_s27 = sld [smem:[#allocation21_spill]] }
 0x20b   : > { %s1888_s28 = sld [smem:[#allocation23_spill]]  ;;  %s1889_s24 = smov %s1376_s25 }
 0x20c   : > { %s1890_s25 = smov %s1380_s26  ;;  %27 = sbr.rel (!%p25_p7) target bundleno = 15 (0xf), region = 133 }
 0x20f   : > { %s1891_s26 = smov %s1886_s16 }
 0x213   :  { %766 = vsyncpa [#allocation3], 1 }
 0x214   :  { %768 = vsyncpa [#allocation3 + $0x1], 1 }
 0x215   :  { %769 = vsyncpa [#allocation6], 1 }
 0x216   :  { %771 = vsyncpa [#allocation6 + $0x1], 1 }
 0x217   :  { %772 = vsyncpa [#allocation9], 1 }
 0x218   :  { %773 = vsyncpa [#allocation12], 1 }
 0x219   :  { %774 = vsyncpa [#allocation4], 1 }
 0x21a   :  { %776 = vsyncpa [#allocation4 + $0x1], 1 }

</bundles_post_ra>
